<compile_context>
chip_gen: v7x
topology: tpu7x:2x2x1
jax: 0.10.0
libtpu: 0.0.40
codegen_flags: <defaults>
</compile_context>

<pallas_src>
import functools

import jax
import jax.numpy as jnp
import numpy as np
from jax import lax
from jax.experimental import pallas as pl
from jax.experimental.pallas import tpu as pltpu

MIN_NORM = 1e-15   # Hyperboloid.min_norm
EPS_F32 = 1e-7     # Hyperboloid.eps[torch.float32]


# --------------------------- kernels ---------------------------

def _lorentz_act_kernel_packed(x_ref, bmat_ref, o_ref, *, c_in, c_out, d):
    """Lane-dense path: each 128-lane row holds 128//d consecutive points."""
    x = x_ref[...].astype(jnp.float32)                     # (TB, 128)
    bmat = bmat_ref[...]                                   # (128, 128) block-diag ones, f32
    lanes = x.shape[-1]

    lane_id = lax.broadcasted_iota(jnp.int32, (1, lanes), 1)
    # d divides 128 => d is a power of two, so (lane & (d-1)) == lane % d.
    is_space = jnp.bitwise_and(lane_id, d - 1) != 0        # space lanes of each segment

    k_in = 1.0 / c_in
    k_out = 1.0 / c_out
    sqrt_k_in = k_in ** 0.5
    sqrt_k_out = k_out ** 0.5
    inv_sqrt_k_in = 1.0 / sqrt_k_in
    inv_sqrt_k_out = 1.0 / sqrt_k_out

    # ---------------- logmap0(x, c_in) ----------------
    y = jnp.where(is_space, x, 0.0)                        # space components
    x_time = x - y                                         # only time lanes nonzero (exact)

    # Per-segment ||y||^2, broadcast across the segment, on the idle MXU.
    y_sq = jnp.dot(y * y, bmat, preferred_element_type=jnp.float32)

    # Exact per-segment broadcast of the time component: log2(d) XLU roll-adds
    # (each 32-consecutive-lane window contains exactly one time lane).
    x0 = x_time
    shift = 1
    while shift < d:
        x0 = x0 + pltpu.roll(x0, shift, 1)
        shift *= 2

    inv_y_norm = lax.rsqrt(jnp.maximum(y_sq, MIN_NORM * MIN_NORM))  # 1/max(||y||, MIN_NORM)
    theta = jnp.maximum(x0 * inv_sqrt_k_in, 1.0 + EPS_F32)
    arcosh = jnp.log(theta + jnp.sqrt(jnp.maximum(theta * theta - 1.0, 0.0)))
    u = (sqrt_k_in * arcosh * inv_y_norm) * y              # time lanes stay 0

    # ---------------- act = ReLU; proj_tan0 is a no-op (time lanes already 0) ----------------
    xt = jnp.maximum(u, 0.0)

    # ---------------- expmap0(xt, c_out) + proj ----------------
    v_sq = jnp.dot(xt * xt, bmat, preferred_element_type=jnp.float32)
    v_sq_c = jnp.maximum(v_sq, MIN_NORM * MIN_NORM)
    inv_v_norm = lax.rsqrt(v_sq_c)
    v_norm = v_sq_c * inv_v_norm                           # sqrt via rsqrt*x (no EUP sqrt)
    theta2 = v_norm * inv_sqrt_k_out
    e_pos = jnp.exp(theta2)
    e_neg = jnp.exp(-theta2)                               # same EUP cost as an approx recip, exact
    sinh_t2 = 0.5 * (e_pos - e_neg)
    cosh_t2 = 0.5 * (e_pos + e_neg)
    space = (sqrt_k_out * sinh_t2 * inv_v_norm) * xt       # time lanes stay 0
    time = sqrt_k_out * cosh_t2                            # == sqrt(k_out + ||space||^2) (proj)
    o_ref[...] = jnp.where(is_space, space, time).astype(o_ref.dtype)


def _lorentz_act_kernel_rowmajor(x_ref, o_ref, *, c_in, c_out):
    """Fallback: one point per row, D lanes (D need not divide 128)."""
    x = x_ref[...].astype(jnp.float32)                     # (TN, D)
    d = x.shape[-1]
    is_space = lax.broadcasted_iota(jnp.int32, (1, d), 1) >= 1

    k_in = 1.0 / c_in
    k_out = 1.0 / c_out
    sqrt_k_in = k_in ** 0.5
    sqrt_k_out = k_out ** 0.5

    # ---------------- logmap0(x, c_in) ----------------
    x0 = x[:, 0:1]
    y = jnp.where(is_space, x, 0.0)
    # TODO(synk): for D >= 128, offload these jnp.sum reduces to the idle MXU
    # (dot against ones) and densify the (TN, 1) EUP chain as in the packed path.
    y_sq = jnp.sum(y * y, axis=-1, keepdims=True)
    inv_y_norm = lax.rsqrt(jnp.maximum(y_sq, MIN_NORM * MIN_NORM))
    theta = jnp.maximum(x0 * (1.0 / sqrt_k_in), 1.0 + EPS_F32)
    arcosh = jnp.log(theta + jnp.sqrt(jnp.maximum(theta * theta - 1.0, 0.0)))
    u = (sqrt_k_in * arcosh * inv_y_norm) * y

    # ---------------- act = ReLU; proj_tan0 no-op ----------------
    xt = jnp.maximum(u, 0.0)

    # ---------------- expmap0(xt, c_out) + proj ----------------
    v_sq = jnp.sum(xt * xt, axis=-1, keepdims=True)
    v_sq_c = jnp.maximum(v_sq, MIN_NORM * MIN_NORM)
    inv_v_norm = lax.rsqrt(v_sq_c)
    v_norm = v_sq_c * inv_v_norm
    theta2 = v_norm * (1.0 / sqrt_k_out)
    e_pos = jnp.exp(theta2)
    e_neg = jnp.exp(-theta2)
    space = (sqrt_k_out * 0.5 * (e_pos - e_neg) * inv_v_norm) * xt
    time = sqrt_k_out * 0.5 * (e_pos + e_neg)              # == sqrt(k_out + ||space||^2)
    o_ref[...] = jnp.where(is_space, space, time).astype(o_ref.dtype)


# --------------------------- wrapper ---------------------------

def _round_up(a, b):
    return ((a + b - 1) // b) * b


def _min_sublanes(*itemsizes):
    smallest = min(itemsizes)
    if smallest >= 4:
        return 8
    if smallest == 2:
        return 16
    return 32


def _choose_block_rows(n_rows, lane_width, sub):
    if n_rows <= sub:
        return max(int(n_rows), 1)          # full-array block (always legal)
    lane_pad = _round_up(lane_width, 128)
    # ~3 MiB of HBM traffic (in + out, f32-padded) per grid step amortizes the
    # ~0.35 us per-step pipeline overhead (>= ~85% of roofline per tile sweep).
    rows = max(sub, (3 * 1024 * 1024) // (2 * lane_pad * 4))
    # v7x megacore: keep >= 4 grid steps for large inputs so the "parallel"
    # grid axis actually spans both TensorCores.
    rows = min(rows, max(sub, _round_up(pl.cdiv(n_rows, 4), sub)))
    return max(sub, (rows // sub) * sub)


def _vmem_limit_bytes(block_rows, lane_width, in_itemsize, out_itemsize):
    lane_pad = _round_up(lane_width, 128)
    io = 2 * block_rows * lane_pad * (in_itemsize + out_itemsize)   # double-buffered in + out
    temps = 16 * block_rows * lane_pad * 4                          # generous f32 intermediates
    const = 128 * 128 * 4 + (2 << 20)                               # ones matrix + headroom
    # Cap below v7x's 64 MiB physical VMEM; v5e/v6e have 128 MiB so this is safe there too.
    return int(min(max(io + temps + const, 16 << 20), 56 << 20))


def lorentz_act(x, c_in=1.0, c_out=1.0, block_rows=None):
    """LorentzAct forward. x: (N, D) hyperboloid points, time component first.

    Activation is hardwired to ReLU (the HGCN default for LorentzAct).
    """
    assert x.ndim == 2, "lorentz_act expects (N, D) inputs"
    n, d = x.shape
    itemsize = jnp.dtype(x.dtype).itemsize
    sub = _min_sublanes(itemsize, itemsize)

    r = 128 // d if (2 <= d <= 128 and 128 % d == 0) else 0
    repack = r >= 1 and n % r == 0 and (n // r) >= sub
    # TODO(synk): when N % (128 // D) != 0 only a <128-row tail would need special
    # handling to still use the packed path; such shapes currently take the
    # row-major fallback instead of padding the whole array.

    if repack:
        n_packed = n // r
        xp = x.reshape(n_packed, 128)                      # contiguous rows -> free reshape
        if block_rows is None:
            block_rows = _choose_block_rows(n_packed, 128, sub)
        seg = np.arange(128) // d
        bmat = jnp.asarray((seg[:, None] == seg[None, :]).astype(np.float32))
        kernel = functools.partial(
            _lorentz_act_kernel_packed, c_in=float(c_in), c_out=float(c_out), d=d)
        out = pl.pallas_call(
            kernel,
            out_shape=jax.ShapeDtypeStruct((n_packed, 128), x.dtype),
            grid_spec=pltpu.PrefetchScalarGridSpec(
                num_scalar_prefetch=0,
                grid=(pl.cdiv(n_packed, block_rows),),     # ragged last block is fine
                in_specs=[
                    pl.BlockSpec((block_rows, 128), lambda i: (i, 0)),
                    pl.BlockSpec((128, 128), lambda i: (0, 0)),   # constant -> stays resident
                ],
                out_specs=pl.BlockSpec((block_rows, 128), lambda i: (i, 0)),
            ),
            compiler_params=pltpu.CompilerParams(
                dimension_semantics=("parallel",),
                vmem_limit_bytes=_vmem_limit_bytes(block_rows, 128, itemsize, itemsize),
            ),
        )(xp, bmat)
        return out.reshape(n, d)

    if block_rows is None:
        block_rows = _choose_block_rows(n, d, sub)
    kernel = functools.partial(
        _lorentz_act_kernel_rowmajor, c_in=float(c_in), c_out=float(c_out))
    return pl.pallas_call(
        kernel,
        out_shape=jax.ShapeDtypeStruct((n, d), x.dtype),
        grid_spec=pltpu.PrefetchScalarGridSpec(
            num_scalar_prefetch=0,
            grid=(pl.cdiv(n, block_rows),),                # ragged last block is fine
            in_specs=[pl.BlockSpec((block_rows, d), lambda i: (i, 0))],
            out_specs=pl.BlockSpec((block_rows, d), lambda i: (i, 0)),
        ),
        compiler_params=pltpu.CompilerParams(
            dimension_semantics=("parallel",),
            vmem_limit_bytes=_vmem_limit_bytes(block_rows, d, itemsize, itemsize),
        ),
    )(x)


# ----------------------------- references (plain JAX) -----------------------------

def _expmap0_ref(u, c):
    """expmap0 used only to build valid hyperboloid inputs."""
    k = 1.0 / c
    sqrt_k = k ** 0.5
    space = u[:, 1:]
    nrm = jnp.maximum(jnp.linalg.norm(space, axis=-1, keepdims=True), MIN_NORM)
    theta = nrm / sqrt_k
    sp = sqrt_k * jnp.sinh(theta) * space / nrm
    time = jnp.sqrt(k + jnp.sum(sp * sp, axis=-1, keepdims=True))
    return jnp.concatenate([time, sp], axis=-1)


def _lorentz_act_ref(x, c_in, c_out):
    """Plain-JAX LorentzAct forward (mirrors the HGCN PyTorch reference)."""
    x = x.astype(jnp.float32)
    k_in = 1.0 / c_in
    sqrt_k_in = k_in ** 0.5
    k_out = 1.0 / c_out
    sqrt_k_out = k_out ** 0.5
    y = x[:, 1:]
    y_norm = jnp.maximum(jnp.linalg.norm(y, axis=-1, keepdims=True), MIN_NORM)
    theta = jnp.maximum(x[:, 0:1] / sqrt_k_in, 1.0 + EPS_F32)
    arcosh = jnp.log(theta + jnp.sqrt(jnp.maximum(theta * theta - 1.0, 0.0)))
    u_space = sqrt_k_in * arcosh * y / y_norm
    xt = jnp.maximum(u_space, 0.0)                          # ReLU; proj_tan0 keeps time = 0
    v_norm = jnp.maximum(jnp.linalg.norm(xt, axis=-1, keepdims=True), MIN_NORM)
    theta2 = v_norm / sqrt_k_out
    space = sqrt_k_out * jnp.sinh(theta2) * xt / v_norm
    time = jnp.sqrt(jnp.maximum(k_out + jnp.sum(space * space, axis=-1, keepdims=True),
                                EPS_F32))
    return jnp.concatenate([time, space], axis=-1)


if __name__ == "__main__":
    c_in, c_out = 1.0, 0.5

    def make_points(key, n, d, c):
        tangent = 0.1 * jax.random.normal(key, (n, d), dtype=jnp.float32)
        tangent = tangent.at[:, 0].set(0.0)
        return _expmap0_ref(tangent, c)

    # (N, D) cases:
    #   (16, 32)   row-major fallback (tiny), 2 full blocks
    #   (20, 32)   row-major fallback, ragged last block (no pad/slice path)
    #   (256, 32)  packed path: (64, 128) lane-dense, 4 full grid steps
    #   (1000, 32) packed path: ragged last packed block, multi-step grid
    #   (24, 48)   row-major fallback (48 does not divide 128)
    cases = [(16, 32), (20, 32), (256, 32), (1000, 32), (24, 48)]
    keys = jax.random.split(jax.random.PRNGKey(0), len(cases))

    for (n, d), k in zip(cases, keys):
        x = make_points(k, n, d, c_in)
        out = lorentz_act(x, c_in=c_in, c_out=c_out)
        jax.block_until_ready(out)
        assert out.shape == (n, d) and out.dtype == x.dtype
        assert bool(jnp.all(jnp.isfinite(out)))
        ref = _lorentz_act_ref(x, c_in, c_out)
        np.testing.assert_allclose(np.asarray(out), np.asarray(ref),
                                   rtol=2e-4, atol=2e-4)

    print("KERNEL_OK")
</pallas_src>

<mosaic_0001>
module attributes {stable_mosaic.version = 11 : i64} {
  func.func @_lorentz_act_kernel_rowmajor(%arg0: i32, %arg1: memref<8x32xf32, #tpu.memory_space<vmem>>, %arg2: memref<8x32xf32, #tpu.memory_space<vmem>>) attributes {dimension_semantics = [#tpu.dimension_semantics<parallel>], iteration_bounds = array<i64: 2>, scalar_prefetch = 0 : i64, scratch_operands = 0 : i64, tpu.core_type = #tpu.core_type<tc>, window_params = [{transform_indices = @transform_0, window_bounds = array<i64: 8, 32>}, {transform_indices = @transform_1, window_bounds = array<i64: 8, 32>}]} {
    %c0 = arith.constant 0 : index
    %c0_0 = arith.constant 0 : index
    %0 = vector.load %arg1[%c0, %c0_0] : memref<8x32xf32, #tpu.memory_space<vmem>>, vector<8x32xf32>
    %1 = tpu.iota {dimensions = array<i32: 1>} : vector<1x32xi32>
    %c1_i32 = arith.constant 1 : i32
    %2 = vector.broadcast %c1_i32 : i32 to vector<1x32xi32>
    %3 = arith.cmpi sge, %1, %2 : vector<1x32xi32>
    %4 = vector.extract_strided_slice %0 {offsets = [0, 0], sizes = [8, 1], strides = [1, 1]} : vector<8x32xf32> to vector<8x1xf32>
    %cst = arith.constant 0.000000e+00 : f32
    %5 = vector.shape_cast %3 : vector<1x32xi1> to vector<1x32xi1>
    %6 = vector.broadcast %5 : vector<1x32xi1> to vector<8x32xi1>
    %7 = vector.broadcast %cst : f32 to vector<8x32xf32>
    %8 = arith.select %6, %0, %7 : vector<8x32xi1>, vector<8x32xf32>
    %9 = arith.mulf %8, %8 : vector<8x32xf32>
    %cst_1 = arith.constant dense<0.000000e+00> : vector<8xf32>
    %10 = vector.multi_reduction <add>, %9, %cst_1 [1] : vector<8x32xf32> to vector<8xf32>
    %11 = vector.shape_cast %10 : vector<8xf32> to vector<8x1xf32>
    %cst_2 = arith.constant 1.000000e-30 : f32
    %12 = vector.broadcast %cst_2 : f32 to vector<8x1xf32>
    %13 = arith.maximumf %11, %12 : vector<8x1xf32>
    %14 = math.rsqrt %13 : vector<8x1xf32>
    %cst_3 = arith.constant 1.000000e+00 : f32
    %15 = vector.broadcast %cst_3 : f32 to vector<8x1xf32>
    %16 = arith.mulf %4, %15 : vector<8x1xf32>
    %cst_4 = arith.constant 1.00000012 : f32
    %17 = vector.broadcast %cst_4 : f32 to vector<8x1xf32>
    %18 = arith.maximumf %16, %17 : vector<8x1xf32>
    %19 = arith.mulf %18, %18 : vector<8x1xf32>
    %cst_5 = arith.constant 1.000000e+00 : f32
    %20 = vector.broadcast %cst_5 : f32 to vector<8x1xf32>
    %21 = arith.subf %19, %20 : vector<8x1xf32>
    %cst_6 = arith.constant 0.000000e+00 : f32
    %22 = vector.broadcast %cst_6 : f32 to vector<8x1xf32>
    %23 = arith.maximumf %21, %22 : vector<8x1xf32>
    %24 = math.sqrt %23 : vector<8x1xf32>
    %25 = arith.addf %18, %24 : vector<8x1xf32>
    %26 = math.log %25 : vector<8x1xf32>
    %cst_7 = arith.constant 1.000000e+00 : f32
    %27 = vector.broadcast %cst_7 : f32 to vector<8x1xf32>
    %28 = arith.mulf %27, %26 : vector<8x1xf32>
    %29 = arith.mulf %28, %14 : vector<8x1xf32>
    %30 = vector.broadcast %29 : vector<8x1xf32> to vector<8x32xf32>
    %31 = arith.mulf %30, %8 : vector<8x32xf32>
    %cst_8 = arith.constant 0.000000e+00 : f32
    %32 = vector.broadcast %cst_8 : f32 to vector<8x32xf32>
    %33 = arith.maximumf %31, %32 : vector<8x32xf32>
    %34 = arith.mulf %33, %33 : vector<8x32xf32>
    %cst_9 = arith.constant dense<0.000000e+00> : vector<8xf32>
    %35 = vector.multi_reduction <add>, %34, %cst_9 [1] : vector<8x32xf32> to vector<8xf32>
    %36 = vector.shape_cast %35 : vector<8xf32> to vector<8x1xf32>
    %cst_10 = arith.constant 1.000000e-30 : f32
    %37 = vector.broadcast %cst_10 : f32 to vector<8x1xf32>
    %38 = arith.maximumf %36, %37 : vector<8x1xf32>
    %39 = math.rsqrt %38 : vector<8x1xf32>
    %40 = arith.mulf %38, %39 : vector<8x1xf32>
    %cst_11 = arith.constant 0.707106769 : f32
    %41 = vector.broadcast %cst_11 : f32 to vector<8x1xf32>
    %42 = arith.mulf %40, %41 : vector<8x1xf32>
    %43 = math.exp %42 : vector<8x1xf32>
    %cst_12 = arith.constant 0.000000e+00 : f32
    %44 = vector.broadcast %cst_12 : f32 to vector<8x1xf32>
    %45 = arith.subf %44, %42 : vector<8x1xf32>
    %46 = math.exp %45 : vector<8x1xf32>
    %47 = arith.subf %43, %46 : vector<8x1xf32>
    %cst_13 = arith.constant 0.707106769 : f32
    %48 = vector.broadcast %cst_13 : f32 to vector<8x1xf32>
    %49 = arith.mulf %48, %47 : vector<8x1xf32>
    %50 = arith.mulf %49, %39 : vector<8x1xf32>
    %51 = vector.broadcast %50 : vector<8x1xf32> to vector<8x32xf32>
    %52 = arith.mulf %51, %33 : vector<8x32xf32>
    %53 = arith.addf %43, %46 : vector<8x1xf32>
    %cst_14 = arith.constant 0.707106769 : f32
    %54 = vector.broadcast %cst_14 : f32 to vector<8x1xf32>
    %55 = arith.mulf %54, %53 : vector<8x1xf32>
    %56 = vector.shape_cast %3 : vector<1x32xi1> to vector<1x32xi1>
    %57 = vector.broadcast %56 : vector<1x32xi1> to vector<8x32xi1>
    %58 = vector.shape_cast %55 : vector<8x1xf32> to vector<8x1xf32>
    %59 = vector.broadcast %58 : vector<8x1xf32> to vector<8x32xf32>
    %60 = arith.select %57, %52, %59 : vector<8x32xi1>, vector<8x32xf32>
    %c0_15 = arith.constant 0 : index
    %c0_16 = arith.constant 0 : index
    %61 = vector.load %arg2[%c0_15, %c0_16] : memref<8x32xf32, #tpu.memory_space<vmem>>, vector<8x32xf32>
    tpu.vector_store %arg2[%c0_15, %c0_16], %60 {strides = array<i32>} : memref<8x32xf32, #tpu.memory_space<vmem>>, vector<8x32xf32>,
    return
  }
  func.func @transform_0(%arg0: i32) -> (i32, i32) {
    %c0_i32 = arith.constant 0 : i32
    %c0_i32_0 = arith.constant 0 : i32
    return %arg0, %c0_i32 : i32, i32
  }
  func.func @transform_1(%arg0: i32) -> (i32, i32) {
    %c0_i32 = arith.constant 0 : i32
    %c0_i32_0 = arith.constant 0 : i32
    return %arg0, %c0_i32 : i32, i32
  }
}

</mosaic_0001>

<bundles_post_ra>
// kernel: tpu_custom_call.1
= control target key start
LH: loop header
LB: loop body
LE: loop exit
PB: predicated region body
PF: predicated region fallthrough
CT: control target
= control target key end

     0   :  { %6 = vsyncpa [#allocation3], 0  ;;  %s632_s0 = inlined_call_operand.hbm [shape: f32[16,32], index: 0, kind: input, shape index: {}]   ;;  %s633_s1 = inlined_call_operand.hbm [shape: f32[16,32], index: 1, kind: output, shape index: {}]  }
   0x1   :  { %8 = vsyncpa [#allocation3 + $0x1], 0 }
   0x2   :  { %9 = vsyncpa [#allocation4], 0 }
   0x3   :  { %11 = vsyncpa [#allocation4 + $0x1], 0  ;;  %s457_s6 = smov 0   ;;  %s459_s7 = smov 0  }
   0x4   :  { %s461_s8 = smov 0   ;;  %s463_s9 = smov 0  }
   0x5 LB: > { %s478_s10 = sadd.s32 4294967295, %s442_s9   ;;  %s273_s11 = sadd.s32 4294967294, %s442_s9   ;;  %s442_s9 = sphi %s463_s9, %s648_s9   ;;  %s438_s8 = sphi %s461_s8, %s647_s8   ;;  %s434_s7 = sphi %s459_s7, %s646_s7   ;;  %s430_s6 = sphi %s457_s6, %s645_s6  }
   0x6   : > { %s482_s12 = sadd.s32 1, %s442_s9   ;;  %s24_s13 = sadd.s32 1, %s438_s8 }
   0x7   : > { %s21_s14 = ssub.s32 %s442_s9, %s482_s12  ;;  %p31_p0 = scmp.ne.s32.totalorder %s438_s8, %s434_s7 }
   0x8   : > { %p22_p1 = scmp.eq.s32.totalorder %s21_s14, 0  ;;  %p32_p2 = scmp.eq.s32.totalorder %s442_s9, 0 }
   0x9   : > { %p37_p3 = scmp.ne.s32.totalorder %s434_s7, %s430_s6  ;;  %p38_p4 = scmp.eq.s32.totalorder %s478_s10, 0 }
   0xa   : > { %s494_s15 = scalar_select %p22_p1, %s438_s8, %s24_s13  }
   0xb   : > { %p496_p5 = por %p32_p2, %p31_p0  ;;  %p500_p6 = por %p38_p4, %p37_p3 }
   0xc   : > { %p61_p7 = scmp.eq.s32.totalorder %s478_s10, 1  ;;  %p67_p8 = scmp.eq.s32.totalorder %s273_s11, 1 }
   0xd   : > { %p298_p10 = scmp.lt.s32.totalorder %s442_s9, 2  ;;  %s87_s20 = sand.u32 1, %s438_s8  }
   0xe   : > { %p507_p11 = por %p61_p7, %p31_p0  ;;  %p511_p12 = por %p67_p8, %p37_p3 }
   0xf   : > { %s277_s21 = sshll.u32 %s442_s9, 7  ;;  %s276_s22 = sshll.u32 %s87_s20, 3 }
  0x10   : > { %s637_s18 = scalar_select %p507_p11, 1, 0 }
  0x11   : > { %s638_s19 = scalar_select %p511_p12, 1, 0 }
  0x12   : > { %s520_s25 = scalar_lea.hbm %s632_s0, %s277_s21  ;;  %s91_s26 = scalar_lea.vmem [#allocation2], %s276_s22 }
  0x13   : > { %s98_s27 = sshll.u32 %s91_s26, 4  ;;  %p524_p13 = pnand %p298_p10, %p496_p5  ;;  %s528_s27 = int_to_ptr.vmem [resolvable:$true] %s98_s27 }
  0x14   : > { %s88_s29 = scalar_lea.sflag [#allocation3], %s87_s20  ;;  %s346_s30 = scalar_lea.hbm %s520_s25, 128 }
  0x15   : > { %p347_p2 = scmp.ne.s32.totalorder %s520_s25, %s346_s30  ;;  %p348_p3 = pneg %p524_p13 }
  0x16   : > { %s351_s4 = scalar_lea.hbm %s632_s0, 256  ;;  %p352_p5 = scmp.lt.u32.totalorder %s520_s25, %s632_s0 }
  0x17   : > { %p349_p4 = pnand %p348_p3, %p347_p2  ;;  %p353_p8 = scmp.lt.u32.totalorder %s351_s4, %s346_s30 }
  0x18   : > { %p355_p9 = scmp.lt.u32.totalorder %s346_s30, %s520_s25 }
  0x19   : > { %p350_p7 = pneg %p349_p4  ;;  %p354_p10 = por %p353_p8, %p352_p5 }
  0x1b   : > { %p356_p0 = por %p355_p9, %p354_p10 }
  0x1d   : > { %p357_p1 = pnand %p356_p0, %p350_p7 }
  0x1f   : > { %360 = shalt.err (!%p357_p1)
}
  0x20   : > { %s361_s13 = scalar_lea.vmem %s528_s27, 128  ;;  %s444_s14 = smov [#allocation2]  }
  0x21   : > { %p362_p2 = scmp.ne.s32.totalorder %s528_s27, %s361_s13  ;;  %s366_s16 = sshll.u32 %s444_s14, 4  ;;  %s367_s16 = int_to_ptr.vmem [resolvable:$false] %s366_s16 }
  0x22   : > { %s368_s20 = scalar_lea.vmem %s367_s16, 256  ;;  %p369_p11 = scmp.lt.s32.totalorder %s528_s27, %s367_s16 }
  0x23   : > { %p364_p4 = pnand %p362_p2, %p348_p3  ;;  %p370_p5 = scmp.lt.s32.totalorder %s368_s20, %s361_s13 }
  0x25   : > { %p365_p12 = pneg %p364_p4  ;;  %p371_p8 = por %p370_p5, %p369_p11 }
  0x27   : > { %p372_p9 = pnand %p371_p8, %p365_p12 }
  0x29   : > { %375 = shalt.err (!%p372_p9)
}
  0x2a   : > { %293 = dma.hbm_to_vmem [thread:$0]  (!%p524_p13), %s520_s25, 128, %s528_s27, %s88_s29  }
  0x2b   : > { %p640_p0 = scmp.lt.s32.totalorder %s442_s9, 3  ;;  %p641_p1 = scmp.ge.s32.totalorder %s442_s9, 1 }
  0x2d   : > { %p104_p3 = pnand %p641_p1, %p640_p0 }
  0x2e   : > { %s562_s21 = sand.u32 (!%p104_p3), 1, %s434_s7  }
  0x2f   : > { %107 = sbr.rel (%p104_p3) target bundleno = 553 (0x229), region = 24  ;;  %s279_s22 = sshll.u32 (!%p104_p3), %s562_s21, 3 }
  0x30   : > { %s110_s23 = scalar_lea.sflag (!%p104_p3), [#allocation3], %s562_s21  ;;  %s113_s24 = scalar_lea.vmem (!%p104_p3), [#allocation2], %s279_s22 }
  0x36   : > { %421 = dma.done.wait (%p500_p6), %s110_s23, 128  }
  0x37   : > { %423 = vsyncadd (%p500_p6), %s110_s23, 4294967168  ;;  %v133_v0 = vlaneseq  ;;  %v132_v2 = vld [vmem:[%s113_s24] sm:$0xff]  ;;  %vm140_vm1 = vcmask 261120   ;;  %v445_v6 = vmov 0   ;;  %s283_s17 = sshll.u32 %s478_s10, 7  ;;  %s131_s25 = scalar_lea.vmem [#allocation5], %s279_s22 }
  0x38   : > { %333 = vset.pattern.permute.xlu0 %v445_v6  ;;  %v146_v7 = vmax.f32 %v132_v2, 1.0000001  ;;  %s203_s26 = sshll.u32 %s131_s25, 4  ;;  %s585_s29 = scalar_lea.hbm %s633_s1, %s283_s17  ;;  %s587_s26 = int_to_ptr.vmem [resolvable:$true] %s203_s26 }
  0x39   : > { %v572_v1 = vand.u32 127, %v133_v0  ;;  %s190_s10 = scalar_lea.sflag [#allocation4], %s562_s21  ;;  %s376_s30 = scalar_lea.vmem %s587_s26, 128 }
  0x3a   : > { %v147_v8 = vmul.f32 %v146_v7, %v146_v7  ;;  %p377_p6 = scmp.ne.s32.totalorder %s587_s26, %s376_s30  ;;  %p642_p11 = scmp.ne.s32.totalorder %s637_s18, 0 }
  0x3b   : > { %vm135_vm0 = vcmp.ge.s32.totalorder %v572_v1, 1  ;;  %s446_s2 = smov [#allocation5]  }
  0x3c   : > { %v138_v3 = vsel %vm135_vm0, %v132_v2, 0.0  ;;  %v281_v9 = vadd.f32 -1.0, %v147_v8  ;;  %p378_p12 = pnand %p377_p6, %p642_p11  ;;  %s380_s3 = sshll.u32 %s446_s2, 4  ;;  %s381_s3 = int_to_ptr.vmem [resolvable:$false] %s380_s3 }
  0x3d   : > { %v139_v4 = vmul.f32 %v138_v3, %v138_v3  ;;  %s382_s4 = scalar_lea.vmem %s381_s3, 256  ;;  %p383_p7 = scmp.lt.s32.totalorder %s587_s26, %s381_s3 }
  0x3e   : > { %v149_v10 = vmax.f32 %v281_v9, 0.0  ;;  %p379_p13 = pneg %p378_p12  ;;  %p384_p10 = scmp.lt.s32.totalorder %s382_s4, %s376_s30 }
  0x3f   : > { %v141_v5 = vsel %vm140_vm1, %v139_v4, 0.0 }
  0x40   : > { %142 = vadd.xlane.f32.xlu0 %v141_v5  ;;  %334 = vrsqrt.f32 %v149_v10  ;;  %vm152_vm2 = vcmp.eq.f32.partialorder %v149_v10, inf  ;;  %v155_v13 = vand.u32 2147483648, %v149_v10  ;;  %vm154_vm3 = vcmp.eq.f32.partialorder %v149_v10, 0.0  ;;  %p385_p2 = por %p384_p10, %p383_p7 }
  0x42   : > { %p386_p4 = pnand %p385_p2, %p379_p13 }
  0x4a   : > { %v335_v11 = vpop.eup %334 }
  0x4b   : > { %v151_v12 = vmul.f32 %v335_v11, %v149_v10 }
  0x4d   : > { %v153_v14 = vsel %vm152_vm2, %v149_v10, %v151_v12 }
  0x4e   : > { %v156_v15 = vsel %vm154_vm3, %v155_v13, %v153_v14 }
  0x4f   : > { %v157_v16 = vadd.f32 %v156_v15, %v146_v7 }
  0x51   : > { %336 = vlog2.f32 %v157_v16 }
  0x5b   : > { %v337_v19 = vpop.eup %336 }
  0x5c   : > { %v159_v20 = vmul.f32 0.6931472, %v337_v19 }
  0xcd   : > { %v143_v17 = vpop.xlane.xlu0 %142 }
  0xce   : > { %v144_v18 = vmax.f32 %v143_v17, 1e-30 }
  0xd0   : > { %338 = vrsqrt.f32 %v144_v18 }
  0xda   : > { %v339_v21 = vpop.eup %338 }
  0xdb   : > { %v160_v22 = vmul.f32 %v339_v21, %v159_v20 }
  0xdd   : > { %163 = vperm.xlu0 %333, %v160_v22  }
 0x15c   : > { %v164_v23 = vpop.permute.xlu0 %163 }
 0x15d   : > { %v166_v24 = vmul.f32 %v164_v23, %v138_v3 }
 0x15f   : > { %v167_v25 = vmax.f32 %v166_v24, 0.0 }
 0x161   : > { %v168_v26 = vmul.f32 %v167_v25, %v167_v25 }
 0x163   : > { %v169_v27 = vsel %vm140_vm1, %v168_v26, 0.0 }
 0x164   : > { %170 = vadd.xlane.f32.xlu1 %v169_v27 }
 0x1f1   : > { %v171_v28 = vpop.xlane.xlu1 %170 }
 0x1f2   : > { %v172_v29 = vmax.f32 %v171_v28, 1e-30 }
 0x1f4   : > { %340 = vrsqrt.f32 %v172_v29 }
 0x1fe   : > { %v341_v30 = vpop.eup %340 }
 0x1ff   : > { %v174_v31 = vmul.f32 %v341_v30, %v172_v29 }
 0x201   : > { %v175_v32 = vmul.f32 0.70710677, %v174_v31 }
 0x203   : > { %v176_v33 = vmul.f32 1.442695, %v175_v32  ;;  %v178_v34 = vsub.f32 0.0, %v175_v32 }
 0x205   : > { %v179_v35 = vmul.f32 1.442695, %v178_v34  ;;  %342 = vpow2.f32 %v176_v33 }
 0x207   : > { %344 = vpow2.f32 %v179_v35 }
 0x20f   : > { %v343_v36 = vpop.eup %342 }
 0x211   : > { %v345_v37 = vpop.eup %344 }
 0x212   : > { %v181_v38 = vsub.f32 %v343_v36, %v345_v37  ;;  %v185_v40 = vadd.f32 %v345_v37, %v343_v36 }
 0x214   : > { %v182_v39 = vmul.f32 0.70710677, %v181_v38  ;;  %v186_v43 = vmul.f32 0.70710677, %v185_v40 }
 0x216   : > { %v183_v41 = vmul.f32 %v341_v30, %v182_v39 }
 0x218   : > { %v184_v42 = vmul.f32 %v183_v41, %v167_v25 }
 0x21a   : > { %v187_v44 = vsel %vm135_vm0, %v184_v42, %v186_v43 }
 0x21b   : > { %188 = vst.msk [vmem:[%s131_s25] sm:$0xff] %vm140_vm1, %v187_v44 }
 0x21c   : > { %389 = shalt.err (!%p386_p4)
}
 0x21d   : > { %s390_s5 = scalar_lea.hbm %s585_s29, 128  ;;  %s394_s14 = scalar_lea.hbm %s633_s1, 256 }
 0x21e   : > { %p391_p5 = scmp.ne.s32.totalorder %s585_s29, %s390_s5  ;;  %p395_p0 = scmp.lt.u32.totalorder %s585_s29, %s633_s1 }
 0x21f   : > { %p396_p1 = scmp.lt.u32.totalorder %s394_s14, %s390_s5  ;;  %p398_p6 = scmp.lt.u32.totalorder %s390_s5, %s585_s29 }
 0x220   : > { %p392_p8 = pnand %p391_p5, %p642_p11 }
 0x221   : > { %p397_p3 = por %p396_p1, %p395_p0 }
 0x222   : > { %p393_p9 = pneg %p392_p8 }
 0x223   : > { %p399_p12 = por %p398_p6, %p397_p3 }
 0x225   : > { %p400_p13 = pnand %p399_p12, %p393_p9 }
 0x227   : > { %403 = shalt.err (!%p400_p13)
}
 0x228   : > { %288 = dma.vmem_to_hbm [thread:$0]  (%p642_p11), %s587_s26, 128, %s585_s29, %s190_s10  }
 0x229 PF: > { %s215_s21 = sand.u32 1, %s430_s6   ;;  %p643_p7 = scmp.ne.s32.totalorder %s638_s19, 0 }
 0x22a   : > { %p644_p10 = scmp.ge.s32.totalorder %s442_s9, 2  ;;  %s216_s22 = scalar_lea.sflag [#allocation4], %s215_s21 }
 0x22c   : > { %p295_p2 = pnand %p644_p10, %p643_p7 }
 0x22e   : > { %425 = dma.done.wait (!%p295_p2), %s216_s22, 128  }
 0x22f   : > { %427 = vsyncadd (!%p295_p2), %s216_s22, 4294967168  ;;  %p14_p4 = scmp.ge.s32.totalorder %s482_s12, 4   ;;  %s645_s6 = smov %s434_s7 }
 0x230   : > { %s646_s7 = smov %s438_s8  ;;  %s647_s8 = smov %s494_s15 }
 0x231   : > { %s648_s9 = smov %s482_s12  ;;  %16 = sbr.rel (!%p14_p4) target bundleno = 5 (0x5), region = 69 }
 0x238   :  { %221 = vsyncpa [#allocation3], 1 }
 0x239   :  { %223 = vsyncpa [#allocation3 + $0x1], 1 }
 0x23a   :  { %224 = vsyncpa [#allocation4], 1 }
 0x23b   :  { %226 = vsyncpa [#allocation4 + $0x1], 1 }

</bundles_post_ra>
